<compile_context>
chip_gen: v5e
topology: v5e:2x2
jax: 0.10.0
libtpu: 0.0.40
codegen_flags: <defaults>
</compile_context>

<pallas_src>
import functools
import math

import jax
import jax.numpy as jnp
from jax.experimental import pallas as pl
from jax.experimental.pallas import tpu as pltpu


# ----------------------------- configuration --------------------------------
BATCH = 2          # bs
N_CTX = 8          # n_ctx
WIDTH = 32         # width
HEADS = 4          # heads
HEAD_DIM = WIDTH // HEADS
INIT_SCALE = 0.25 / math.sqrt(WIDTH)

# jnp.float32 = exact parity with the PyTorch module.  Set to jnp.bfloat16 on
# v6e/v7x (and for the v5e MXU) to hit the native MXU fast path; accumulation
# stays f32 via preferred_element_type, elementwise math stays f32.
MXU_DTYPE = jnp.float32


# -------------------------------- kernel ------------------------------------
def mha_kernel(batch, heads, x_ref, wqkv_ref, bqkv_ref, wproj_ref, bproj_ref,
               o_ref):
    """Fused c_qkv -> QKV multi-head attention -> c_proj.

    x_ref:     (B*S, W)    activations (flattened batch*seq)
    wqkv_ref:  (W, 3*W)    part-major QKV weight [Q_all | K_all | V_all],
                           Q columns pre-scaled by dh**-0.5 (trace time)
    bqkv_ref:  (1, 3*W)    matching lane-dense bias row (Q part pre-scaled)
    wproj_ref: (W, W)      output projection (input features are head-major)
    bproj_ref: (1, W)      output projection bias
    o_ref:     (B*S, W)
    """
    bs, w = x_ref.shape
    s = bs // batch
    dh = w // heads

    # ---- c_qkv: one wide MXU dot for every head / every part -----------------
    x_mm = x_ref[...].astype(MXU_DTYPE)
    qkv = jnp.dot(x_mm, wqkv_ref[...].astype(MXU_DTYPE),
                  preferred_element_type=jnp.float32) + bqkv_ref[...]   # (B*S, 3W) f32

    # ---- per-head attention (trace-time unrolled, H is small) ----------------
    head_outs = []
    for h in range(heads):                       # static lane slices of qkv
        lo = h * dh
        q = qkv[:, lo:lo + dh].reshape(batch, s, dh).astype(MXU_DTYPE)
        k = qkv[:, w + lo:w + lo + dh].reshape(batch, s, dh).astype(MXU_DTYPE)
        v = qkv[:, 2 * w + lo:2 * w + lo + dh].reshape(batch, s, dh).astype(MXU_DTYPE)

        # Scaling already folded into the Q weights/bias (dh**-0.5).
        att = jnp.einsum("bqd,bkd->bqk", q, k,
                         preferred_element_type=jnp.float32)            # (B, S, S)
        att = att - jnp.max(att, axis=-1, keepdims=True)
        att = jnp.exp(att)
        att = att * pl.reciprocal(jnp.sum(att, axis=-1, keepdims=True),
                                  approx=True)

        o_h = jnp.einsum("bqk,bkd->bqd", att.astype(MXU_DTYPE), v,
                         preferred_element_type=jnp.float32)            # (B, S, dh)
        head_outs.append(o_h.reshape(bs, dh))

    # ---- head-major merge + single output projection dot ---------------------
    merged = jnp.concatenate(head_outs, axis=-1).astype(MXU_DTYPE)      # (B*S, W)
    out = jnp.dot(merged, wproj_ref[...].astype(MXU_DTYPE),
                  preferred_element_type=jnp.float32) + bproj_ref[...]
    o_ref[...] = out.astype(o_ref.dtype)


# ------------------------------ kernel wrapper -------------------------------
def _full_spec(a):
    nd = a.ndim
    return pl.BlockSpec(a.shape, lambda i, nd=nd: (0,) * nd)


def multihead_attention(x, qkv_w, qkv_b, proj_w, proj_b, heads=HEADS):
    """x: (bs, n_ctx, width).  Weights are stored pre-transposed [in, out] so
    y = x @ W + b matches nn.Linear(x) = x @ weight.T + bias."""
    b, s, w = x.shape
    dh = w // heads

    # Trace-time weight re-layout.  c_qkv output feature f = h*3*dh + part*dh + c
    # (matching QKVMultiheadAttention's view + split).  Re-order to part-major
    # f' = part*W + h*dh + c so the kernel takes static per-head lane slices of
    # one wide matmul result.  Fold the q*scale * k*scale = q.k * dh**-0.5
    # scaling into the Q columns (part 0) of the weight and bias.
    q_scale = jnp.array([1.0 / math.sqrt(dh), 1.0, 1.0], jnp.float32)
    wqkv = qkv_w.reshape(w, heads, 3, dh).transpose(0, 2, 1, 3)          # (W,3,H,dh)
    wqkv = (wqkv * q_scale.reshape(1, 3, 1, 1)).reshape(w, 3 * w)        # (W, 3W)
    bqkv = qkv_b.reshape(heads, 3, dh).transpose(1, 0, 2)                # (3,H,dh)
    bqkv = (bqkv * q_scale.reshape(3, 1, 1)).reshape(1, 3 * w)           # (1, 3W)
    # c_proj input feature g = h*dh + c matches the kernel's head-major merge;
    # proj_w needs no re-layout.
    bproj = proj_b.reshape(1, w)

    x2 = x.reshape(b * s, w)                                             # lane-dense I/O

    kernel = functools.partial(mha_kernel, b, heads)
    operands = (x2, wqkv, bqkv, proj_w, bproj)
    out = pl.pallas_call(
        kernel,
        out_shape=jax.ShapeDtypeStruct((b * s, w), x.dtype),
        grid=(1,),   # whole problem (<100 KiB) is VMEM-resident; a parallel
                     # batch/head grid axis only pays off on v7x at larger sizes.
        in_specs=[_full_spec(a) for a in operands],
        out_specs=pl.BlockSpec((b * s, w), lambda i: (0, 0)),
        compiler_params=pltpu.CompilerParams(dimension_semantics=("arbitrary",)),
    )(*operands)
    return out.reshape(b, s, w)


# ------------------------------ pure-JAX reference ---------------------------
def mha_ref(x, qkv_w, qkv_b, proj_w, proj_b, heads):
    """Mirrors the PyTorch MultiheadAttention / QKVMultiheadAttention forward."""
    bs, n_ctx, width = x.shape
    qkv = x @ qkv_w + qkv_b                                   # c_qkv
    attn_ch = qkv.shape[-1] // heads // 3
    scale = 1.0 / math.sqrt(math.sqrt(attn_ch))
    qkv = qkv.reshape(bs, n_ctx, heads, -1)
    q, k, v = jnp.split(qkv, 3, axis=-1)
    weight = jnp.einsum("bthc,bshc->bhts", q * scale, k * scale)
    weight = jax.nn.softmax(weight.astype(jnp.float32), axis=-1).astype(weight.dtype)
    a = jnp.einsum("bhts,bshc->bthc", weight, v).reshape(bs, n_ctx, -1)
    return a @ proj_w + proj_b                                # c_proj


# ----------------------------------- main ------------------------------------
if __name__ == "__main__":
    key = jax.random.PRNGKey(0)
    kx, kw1, kb1, kw2, kb2 = jax.random.split(key, 5)

    x = jax.random.normal(kx, (BATCH, N_CTX, WIDTH), jnp.float32)
    # init_linear: weight ~ N(0, init_scale); bias would be 0 there -- use small
    # random biases here so the bias path is actually exercised.
    qkv_w = jax.random.normal(kw1, (WIDTH, 3 * WIDTH), jnp.float32) * INIT_SCALE
    qkv_b = jax.random.normal(kb1, (3 * WIDTH,), jnp.float32) * 0.02
    proj_w = jax.random.normal(kw2, (WIDTH, WIDTH), jnp.float32) * INIT_SCALE
    proj_b = jax.random.normal(kb2, (WIDTH,), jnp.float32) * 0.02

    out = multihead_attention(x, qkv_w, qkv_b, proj_w, proj_b, HEADS)
    out = jax.block_until_ready(out)
    assert out.shape == (BATCH, N_CTX, WIDTH), out.shape

    ref = mha_ref(x, qkv_w, qkv_b, proj_w, proj_b, HEADS)
    max_err = float(jnp.max(jnp.abs(out - ref)))
    assert max_err < 2e-3, f"max abs err vs reference: {max_err}"
    print("KERNEL_OK")
</pallas_src>

<mosaic_0001>
module attributes {stable_mosaic.version = 11 : i64} {
  func.func @mha_kernel(%arg0: i32, %arg1: memref<16x32xf32, #tpu.memory_space<vmem>>, %arg2: memref<32x96xf32, #tpu.memory_space<vmem>>, %arg3: memref<1x96xf32, #tpu.memory_space<vmem>>, %arg4: memref<32x32xf32, #tpu.memory_space<vmem>>, %arg5: memref<1x32xf32, #tpu.memory_space<vmem>>, %arg6: memref<16x32xf32, #tpu.memory_space<vmem>>) attributes {dimension_semantics = [#tpu.dimension_semantics<arbitrary>], iteration_bounds = array<i64: 1>, scalar_prefetch = 0 : i64, scratch_operands = 0 : i64, tpu.core_type = #tpu.core_type<tc>, window_params = [{pipeline_mode = #tpu.pipeline_mode<synchronous>, transform_indices = @transform_0, window_bounds = array<i64: 16, 32>}, {pipeline_mode = #tpu.pipeline_mode<synchronous>, transform_indices = @transform_1, window_bounds = array<i64: 32, 96>}, {pipeline_mode = #tpu.pipeline_mode<synchronous>, transform_indices = @transform_2, window_bounds = array<i64: 1, 96>}, {pipeline_mode = #tpu.pipeline_mode<synchronous>, transform_indices = @transform_3, window_bounds = array<i64: 32, 32>}, {pipeline_mode = #tpu.pipeline_mode<synchronous>, transform_indices = @transform_4, window_bounds = array<i64: 1, 32>}, {pipeline_mode = #tpu.pipeline_mode<synchronous>, transform_indices = @transform_5, window_bounds = array<i64: 16, 32>}]} {
    %c0 = arith.constant 0 : index
    %c0_0 = arith.constant 0 : index
    %0 = vector.load %arg1[%c0, %c0_0] : memref<16x32xf32, #tpu.memory_space<vmem>>, vector<16x32xf32>
    %c0_1 = arith.constant 0 : index
    %c0_2 = arith.constant 0 : index
    %1 = vector.load %arg2[%c0_1, %c0_2] : memref<32x96xf32, #tpu.memory_space<vmem>>, vector<32x96xf32>
    %cst = arith.constant dense<0.000000e+00> : vector<16x96xf32>
    %2 = tpu.matmul %0, %1, %cst {dimension_numbers = #tpu.dot_dimension_numbers<[1], [0], [0], [1], [0, 0, 1, 1], [], []>} : vector<16x32xf32>, vector<32x96xf32>, vector<16x96xf32> -> vector<16x96xf32>
    %c0_3 = arith.constant 0 : index
    %c0_4 = arith.constant 0 : index
    %3 = vector.load %arg3[%c0_3, %c0_4] : memref<1x96xf32, #tpu.memory_space<vmem>>, vector<1x96xf32>
    %4 = vector.broadcast %3 : vector<1x96xf32> to vector<16x96xf32>
    %5 = arith.addf %2, %4 : vector<16x96xf32>
    %6 = vector.extract_strided_slice %5 {offsets = [0, 0], sizes = [16, 8], strides = [1, 1]} : vector<16x96xf32> to vector<16x8xf32>
    %7 = vector.shape_cast %6 : vector<16x8xf32> to vector<2x8x8xf32>
    %8 = vector.extract_strided_slice %5 {offsets = [0, 32], sizes = [16, 8], strides = [1, 1]} : vector<16x96xf32> to vector<16x8xf32>
    %9 = vector.shape_cast %8 : vector<16x8xf32> to vector<2x8x8xf32>
    %10 = vector.extract_strided_slice %5 {offsets = [0, 64], sizes = [16, 8], strides = [1, 1]} : vector<16x96xf32> to vector<16x8xf32>
    %11 = vector.shape_cast %10 : vector<16x8xf32> to vector<2x8x8xf32>
    "tpu.trace_start"() <{level = 10 : i32, message = "bqd,bkd->bqk"}> : () -> ()
    %cst_5 = arith.constant dense<0.000000e+00> : vector<2x8x8xf32>
    %12 = tpu.matmul %7, %9, %cst_5 {dimension_numbers = #tpu.dot_dimension_numbers<[2], [2], [1], [1], [0, 0, 0, 1, 1, 1], [0], [0]>} : vector<2x8x8xf32>, vector<2x8x8xf32>, vector<2x8x8xf32> -> vector<2x8x8xf32>
    "tpu.trace_stop"() : () -> ()
    %cst_6 = arith.constant dense<0xFF800000> : vector<2x8xf32>
    %13 = vector.multi_reduction <maximumf>, %12, %cst_6 [2] : vector<2x8x8xf32> to vector<2x8xf32>
    %14 = vector.shape_cast %13 : vector<2x8xf32> to vector<2x8x1xf32>
    %15 = vector.broadcast %14 : vector<2x8x1xf32> to vector<2x8x8xf32>
    %16 = arith.subf %12, %15 : vector<2x8x8xf32>
    %17 = math.exp %16 : vector<2x8x8xf32>
    %cst_7 = arith.constant dense<0.000000e+00> : vector<2x8xf32>
    %18 = vector.multi_reduction <add>, %17, %cst_7 [2] : vector<2x8x8xf32> to vector<2x8xf32>
    %19 = vector.shape_cast %18 : vector<2x8xf32> to vector<2x8x1xf32>
    %20 = tpu.reciprocal %19 {approx = true} : vector<2x8x1xf32> -> vector<2x8x1xf32>
    %21 = vector.broadcast %20 : vector<2x8x1xf32> to vector<2x8x8xf32>
    %22 = arith.mulf %17, %21 : vector<2x8x8xf32>
    "tpu.trace_start"() <{level = 10 : i32, message = "bqk,bkd->bqd"}> : () -> ()
    %cst_8 = arith.constant dense<0.000000e+00> : vector<2x8x8xf32>
    %23 = tpu.matmul %22, %11, %cst_8 {dimension_numbers = #tpu.dot_dimension_numbers<[2], [1], [1], [2], [0, 0, 0, 1, 1, 2], [0], [0]>} : vector<2x8x8xf32>, vector<2x8x8xf32>, vector<2x8x8xf32> -> vector<2x8x8xf32>
    "tpu.trace_stop"() : () -> ()
    %24 = vector.shape_cast %23 : vector<2x8x8xf32> to vector<16x8xf32>
    %25 = vector.extract_strided_slice %5 {offsets = [0, 8], sizes = [16, 8], strides = [1, 1]} : vector<16x96xf32> to vector<16x8xf32>
    %26 = vector.shape_cast %25 : vector<16x8xf32> to vector<2x8x8xf32>
    %27 = vector.extract_strided_slice %5 {offsets = [0, 40], sizes = [16, 8], strides = [1, 1]} : vector<16x96xf32> to vector<16x8xf32>
    %28 = vector.shape_cast %27 : vector<16x8xf32> to vector<2x8x8xf32>
    %29 = vector.extract_strided_slice %5 {offsets = [0, 72], sizes = [16, 8], strides = [1, 1]} : vector<16x96xf32> to vector<16x8xf32>
    %30 = vector.shape_cast %29 : vector<16x8xf32> to vector<2x8x8xf32>
    "tpu.trace_start"() <{level = 10 : i32, message = "bqd,bkd->bqk"}> : () -> ()
    %cst_9 = arith.constant dense<0.000000e+00> : vector<2x8x8xf32>
    %31 = tpu.matmul %26, %28, %cst_9 {dimension_numbers = #tpu.dot_dimension_numbers<[2], [2], [1], [1], [0, 0, 0, 1, 1, 1], [0], [0]>} : vector<2x8x8xf32>, vector<2x8x8xf32>, vector<2x8x8xf32> -> vector<2x8x8xf32>
    "tpu.trace_stop"() : () -> ()
    %cst_10 = arith.constant dense<0xFF800000> : vector<2x8xf32>
    %32 = vector.multi_reduction <maximumf>, %31, %cst_10 [2] : vector<2x8x8xf32> to vector<2x8xf32>
    %33 = vector.shape_cast %32 : vector<2x8xf32> to vector<2x8x1xf32>
    %34 = vector.broadcast %33 : vector<2x8x1xf32> to vector<2x8x8xf32>
    %35 = arith.subf %31, %34 : vector<2x8x8xf32>
    %36 = math.exp %35 : vector<2x8x8xf32>
    %cst_11 = arith.constant dense<0.000000e+00> : vector<2x8xf32>
    %37 = vector.multi_reduction <add>, %36, %cst_11 [2] : vector<2x8x8xf32> to vector<2x8xf32>
    %38 = vector.shape_cast %37 : vector<2x8xf32> to vector<2x8x1xf32>
    %39 = tpu.reciprocal %38 {approx = true} : vector<2x8x1xf32> -> vector<2x8x1xf32>
    %40 = vector.broadcast %39 : vector<2x8x1xf32> to vector<2x8x8xf32>
    %41 = arith.mulf %36, %40 : vector<2x8x8xf32>
    "tpu.trace_start"() <{level = 10 : i32, message = "bqk,bkd->bqd"}> : () -> ()
    %cst_12 = arith.constant dense<0.000000e+00> : vector<2x8x8xf32>
    %42 = tpu.matmul %41, %30, %cst_12 {dimension_numbers = #tpu.dot_dimension_numbers<[2], [1], [1], [2], [0, 0, 0, 1, 1, 2], [0], [0]>} : vector<2x8x8xf32>, vector<2x8x8xf32>, vector<2x8x8xf32> -> vector<2x8x8xf32>
    "tpu.trace_stop"() : () -> ()
    %43 = vector.shape_cast %42 : vector<2x8x8xf32> to vector<16x8xf32>
    %44 = vector.extract_strided_slice %5 {offsets = [0, 16], sizes = [16, 8], strides = [1, 1]} : vector<16x96xf32> to vector<16x8xf32>
    %45 = vector.shape_cast %44 : vector<16x8xf32> to vector<2x8x8xf32>
    %46 = vector.extract_strided_slice %5 {offsets = [0, 48], sizes = [16, 8], strides = [1, 1]} : vector<16x96xf32> to vector<16x8xf32>
    %47 = vector.shape_cast %46 : vector<16x8xf32> to vector<2x8x8xf32>
    %48 = vector.extract_strided_slice %5 {offsets = [0, 80], sizes = [16, 8], strides = [1, 1]} : vector<16x96xf32> to vector<16x8xf32>
    %49 = vector.shape_cast %48 : vector<16x8xf32> to vector<2x8x8xf32>
    "tpu.trace_start"() <{level = 10 : i32, message = "bqd,bkd->bqk"}> : () -> ()
    %cst_13 = arith.constant dense<0.000000e+00> : vector<2x8x8xf32>
    %50 = tpu.matmul %45, %47, %cst_13 {dimension_numbers = #tpu.dot_dimension_numbers<[2], [2], [1], [1], [0, 0, 0, 1, 1, 1], [0], [0]>} : vector<2x8x8xf32>, vector<2x8x8xf32>, vector<2x8x8xf32> -> vector<2x8x8xf32>
    "tpu.trace_stop"() : () -> ()
    %cst_14 = arith.constant dense<0xFF800000> : vector<2x8xf32>
    %51 = vector.multi_reduction <maximumf>, %50, %cst_14 [2] : vector<2x8x8xf32> to vector<2x8xf32>
    %52 = vector.shape_cast %51 : vector<2x8xf32> to vector<2x8x1xf32>
    %53 = vector.broadcast %52 : vector<2x8x1xf32> to vector<2x8x8xf32>
    %54 = arith.subf %50, %53 : vector<2x8x8xf32>
    %55 = math.exp %54 : vector<2x8x8xf32>
    %cst_15 = arith.constant dense<0.000000e+00> : vector<2x8xf32>
    %56 = vector.multi_reduction <add>, %55, %cst_15 [2] : vector<2x8x8xf32> to vector<2x8xf32>
    %57 = vector.shape_cast %56 : vector<2x8xf32> to vector<2x8x1xf32>
    %58 = tpu.reciprocal %57 {approx = true} : vector<2x8x1xf32> -> vector<2x8x1xf32>
    %59 = vector.broadcast %58 : vector<2x8x1xf32> to vector<2x8x8xf32>
    %60 = arith.mulf %55, %59 : vector<2x8x8xf32>
    "tpu.trace_start"() <{level = 10 : i32, message = "bqk,bkd->bqd"}> : () -> ()
    %cst_16 = arith.constant dense<0.000000e+00> : vector<2x8x8xf32>
    %61 = tpu.matmul %60, %49, %cst_16 {dimension_numbers = #tpu.dot_dimension_numbers<[2], [1], [1], [2], [0, 0, 0, 1, 1, 2], [0], [0]>} : vector<2x8x8xf32>, vector<2x8x8xf32>, vector<2x8x8xf32> -> vector<2x8x8xf32>
    "tpu.trace_stop"() : () -> ()
    %62 = vector.shape_cast %61 : vector<2x8x8xf32> to vector<16x8xf32>
    %63 = vector.extract_strided_slice %5 {offsets = [0, 24], sizes = [16, 8], strides = [1, 1]} : vector<16x96xf32> to vector<16x8xf32>
    %64 = vector.shape_cast %63 : vector<16x8xf32> to vector<2x8x8xf32>
    %65 = vector.extract_strided_slice %5 {offsets = [0, 56], sizes = [16, 8], strides = [1, 1]} : vector<16x96xf32> to vector<16x8xf32>
    %66 = vector.shape_cast %65 : vector<16x8xf32> to vector<2x8x8xf32>
    %67 = vector.extract_strided_slice %5 {offsets = [0, 88], sizes = [16, 8], strides = [1, 1]} : vector<16x96xf32> to vector<16x8xf32>
    %68 = vector.shape_cast %67 : vector<16x8xf32> to vector<2x8x8xf32>
    "tpu.trace_start"() <{level = 10 : i32, message = "bqd,bkd->bqk"}> : () -> ()
    %cst_17 = arith.constant dense<0.000000e+00> : vector<2x8x8xf32>
    %69 = tpu.matmul %64, %66, %cst_17 {dimension_numbers = #tpu.dot_dimension_numbers<[2], [2], [1], [1], [0, 0, 0, 1, 1, 1], [0], [0]>} : vector<2x8x8xf32>, vector<2x8x8xf32>, vector<2x8x8xf32> -> vector<2x8x8xf32>
    "tpu.trace_stop"() : () -> ()
    %cst_18 = arith.constant dense<0xFF800000> : vector<2x8xf32>
    %70 = vector.multi_reduction <maximumf>, %69, %cst_18 [2] : vector<2x8x8xf32> to vector<2x8xf32>
    %71 = vector.shape_cast %70 : vector<2x8xf32> to vector<2x8x1xf32>
    %72 = vector.broadcast %71 : vector<2x8x1xf32> to vector<2x8x8xf32>
    %73 = arith.subf %69, %72 : vector<2x8x8xf32>
    %74 = math.exp %73 : vector<2x8x8xf32>
    %cst_19 = arith.constant dense<0.000000e+00> : vector<2x8xf32>
    %75 = vector.multi_reduction <add>, %74, %cst_19 [2] : vector<2x8x8xf32> to vector<2x8xf32>
    %76 = vector.shape_cast %75 : vector<2x8xf32> to vector<2x8x1xf32>
    %77 = tpu.reciprocal %76 {approx = true} : vector<2x8x1xf32> -> vector<2x8x1xf32>
    %78 = vector.broadcast %77 : vector<2x8x1xf32> to vector<2x8x8xf32>
    %79 = arith.mulf %74, %78 : vector<2x8x8xf32>
    "tpu.trace_start"() <{level = 10 : i32, message = "bqk,bkd->bqd"}> : () -> ()
    %cst_20 = arith.constant dense<0.000000e+00> : vector<2x8x8xf32>
    %80 = tpu.matmul %79, %68, %cst_20 {dimension_numbers = #tpu.dot_dimension_numbers<[2], [1], [1], [2], [0, 0, 0, 1, 1, 2], [0], [0]>} : vector<2x8x8xf32>, vector<2x8x8xf32>, vector<2x8x8xf32> -> vector<2x8x8xf32>
    "tpu.trace_stop"() : () -> ()
    %81 = vector.shape_cast %80 : vector<2x8x8xf32> to vector<16x8xf32>
    %82 = tpu.concatenate %24, %43, %62, %81 in 1 : vector<16x8xf32>, vector<16x8xf32>, vector<16x8xf32>, vector<16x8xf32> -> vector<16x32xf32>
    %c0_21 = arith.constant 0 : index
    %c0_22 = arith.constant 0 : index
    %83 = vector.load %arg4[%c0_21, %c0_22] : memref<32x32xf32, #tpu.memory_space<vmem>>, vector<32x32xf32>
    %cst_23 = arith.constant dense<0.000000e+00> : vector<16x32xf32>
    %84 = tpu.matmul %82, %83, %cst_23 {dimension_numbers = #tpu.dot_dimension_numbers<[1], [0], [0], [1], [0, 0, 1, 1], [], []>} : vector<16x32xf32>, vector<32x32xf32>, vector<16x32xf32> -> vector<16x32xf32>
    %c0_24 = arith.constant 0 : index
    %c0_25 = arith.constant 0 : index
    %85 = vector.load %arg5[%c0_24, %c0_25] : memref<1x32xf32, #tpu.memory_space<vmem>>, vector<1x32xf32>
    %86 = vector.broadcast %85 : vector<1x32xf32> to vector<16x32xf32>
    %87 = arith.addf %84, %86 : vector<16x32xf32>
    %c0_26 = arith.constant 0 : index
    %c0_27 = arith.constant 0 : index
    %88 = vector.load %arg6[%c0_26, %c0_27] : memref<16x32xf32, #tpu.memory_space<vmem>>, vector<16x32xf32>
    tpu.vector_store %arg6[%c0_26, %c0_27], %87 {strides = array<i32>} : memref<16x32xf32, #tpu.memory_space<vmem>>, vector<16x32xf32>,
    return
  }
  func.func @transform_0(%arg0: i32) -> (i32, i32) {
    %c0_i32 = arith.constant 0 : i32
    %c0_i32_0 = arith.constant 0 : i32
    %c0_i32_1 = arith.constant 0 : i32
    return %c0_i32, %c0_i32_0 : i32, i32
  }
  func.func @transform_1(%arg0: i32) -> (i32, i32) {
    %c0_i32 = arith.constant 0 : i32
    %c0_i32_0 = arith.constant 0 : i32
    %c0_i32_1 = arith.constant 0 : i32
    return %c0_i32, %c0_i32_0 : i32, i32
  }
  func.func @transform_2(%arg0: i32) -> (i32, i32) {
    %c0_i32 = arith.constant 0 : i32
    %c0_i32_0 = arith.constant 0 : i32
    %c0_i32_1 = arith.constant 0 : i32
    return %c0_i32, %c0_i32_0 : i32, i32
  }
  func.func @transform_3(%arg0: i32) -> (i32, i32) {
    %c0_i32 = arith.constant 0 : i32
    %c0_i32_0 = arith.constant 0 : i32
    %c0_i32_1 = arith.constant 0 : i32
    return %c0_i32, %c0_i32_0 : i32, i32
  }
  func.func @transform_4(%arg0: i32) -> (i32, i32) {
    %c0_i32 = arith.constant 0 : i32
    %c0_i32_0 = arith.constant 0 : i32
    %c0_i32_1 = arith.constant 0 : i32
    return %c0_i32, %c0_i32_0 : i32, i32
  }
  func.func @transform_5(%arg0: i32) -> (i32, i32) {
    %c0_i32 = arith.constant 0 : i32
    %c0_i32_0 = arith.constant 0 : i32
    %c0_i32_1 = arith.constant 0 : i32
    return %c0_i32, %c0_i32_0 : i32, i32
  }
}

</mosaic_0001>

<bundles_post_ra>
// kernel: tpu_custom_call.1
= control target key start
LH: loop header
LB: loop body
LE: loop exit
PB: predicated region body
PF: predicated region fallthrough
CT: control target
= control target key end

     0   :  { %10 = vsyncpa [#allocation3], 0  ;;  %s1094_s0 = inlined_call_operand.hbm [shape: f32[16,32], index: 0, kind: input, shape index: {}]   ;;  %s1095_s1 = inlined_call_operand.hbm [shape: f32[32,96], index: 1, kind: input, shape index: {}]   ;;  %s1096_s2 = inlined_call_operand.vmem [shape: f32[1,96], index: 2, kind: input, shape index: {}]   ;;  %s1097_s3 = inlined_call_operand.hbm [shape: f32[32,32], index: 3, kind: input, shape index: {}]   ;;  %s1098_s4 = inlined_call_operand.vmem [shape: f32[1,32], index: 4, kind: input, shape index: {}]   ;;  %s1099_s5 = inlined_call_operand.hbm [shape: f32[16,32], index: 5, kind: output, shape index: {}]  }
   0x1   :  { %11 = vsyncpa [#allocation6], 0 }
   0x2   :  { %12 = vsyncpa [#allocation4], 0  ;;  %s30_s20 = sshll.u32 %s1095_s1, 4  ;;  %s911_s21 = smov [#allocation5]   ;;  %s31_s20 = int_to_ptr.hbm [resolvable:$true] %s30_s20 }
   0x3   :  { %s32_s22 = sshll.u32 %s911_s21, 4  ;;  %s17_s25 = sshll.u32 %s1094_s0, 4  ;;  %s33_s22 = int_to_ptr.vmem [resolvable:$true] %s32_s22  ;;  %s18_s25 = int_to_ptr.hbm [resolvable:$true] %s17_s25 }
   0x4   :  { %s912_s26 = smov 128   ;;  %s913_s27 = smov 8  }
   0x5   :  { %38 = dma.hbm_to_vmem [thread:$0]  %s31_s20, 512, %s33_s22, [#allocation6], %s912_s26, %s912_s26, %s913_s27  }
   0x6   :  { %s914_s28 = smov [#allocation2]   ;;  %s45_s1 = sshll.u32 %s1097_s3, 4  ;;  %s46_s1 = int_to_ptr.hbm [resolvable:$true] %s45_s1 }
   0x7   :  { %s19_s29 = sshll.u32 %s914_s28, 4  ;;  %s915_s0 = smov [#allocation7]   ;;  %s20_s29 = int_to_ptr.vmem [resolvable:$true] %s19_s29 }
   0x8   :  { %25 = dma.hbm_to_vmem [thread:$0]  %s18_s25, 256, %s20_s29, [#allocation3], %s912_s26, %s912_s26, %s913_s27  }
   0x9   :  { %s47_s7 = sshll.u32 %s915_s0, 4  ;;  %s48_s7 = int_to_ptr.vmem [resolvable:$true] %s47_s7 }
   0xa   :  { %53 = dma.hbm_to_vmem [thread:$0]  %s46_s1, 512, %s48_s7, [#allocation6], %s912_s26, %s912_s26, %s913_s27  }
   0xb   :  { %905 = dma.done.wait [#allocation3], 256  }
   0xc   :  { %906 = vsyncadd [#allocation3], 4294967040 }
   0xd   :  { %907 = dma.done.wait [#allocation6], 1024  }
   0xe   :  { %908 = vsyncadd [#allocation6], 4294966272  ;;  %v73_v0 = vld [vmem:[#allocation5 + $0x18] sm:$0xff]  ;;  %v72_v1 = vld [vmem:[#allocation5 + $0x10] sm:$0xff]  ;;  %vm78_vm0 = vcmask 261120   ;;  %s916_s9 = smov 88  }
   0xf   :  { %97 = vmatpush.msra.mxu0 %v73_v0  ;;  %v71_v2 = vld [vmem:[#allocation5 + $0x8] sm:$0xff]  ;;  %v70_v3 = vld [vmem:[#allocation5] sm:$0xff]  ;;  %v68_v4 = vld [vmem:[#allocation2] sm:$0xff]  ;;  %s917_s10 = smov 96   ;;  %s918_s11 = smov 80   ;;  %vm111_vm1 = vcmask 64512  }
  0x10   :  { %v69_v5 = vld [vmem:[#allocation2 + $0x8] sm:$0xff]  ;;  %v775_v6 = vld [vmem:[%s1096_s2] ss:$0 sm:$0xff]  ;;  %s919_s2 = smov 120   ;;  %s920_s12 = smov 72   ;;  %vm653_vm2 = vcmask 130048  }
  0x11   :  { %98 = vmatpush.msra.mxu0 %v72_v1  ;;  %s921_s13 = smov 112   ;;  %s922_s14 = smov 104   ;;  %vm656_vm3 = vcmask 195584  }
  0x12   :  { %s923_s15 = smov 56   ;;  %s924_s16 = smov 64  }
  0x13   :  { %99 = vmatpush.msra.mxu0 %v71_v2  ;;  %s925_s17 = smov 48   ;;  %s926_s18 = smov 40  }
  0x14   :  { %s927_s19 = smov 16   ;;  %s928_s20 = smov 24  }
  0x15   :  { %100 = vmatpush.msra.mxu0 %v70_v3  ;;  %s929_s23 = smov [#allocation8]   ;;  %s704_s29 = sshll.u32 %s1099_s5, 4  ;;  %s705_s29 = int_to_ptr.hbm [resolvable:$true] %s704_s29 }
  0x16   :  { %718 = vmatmul.msk.f32.vlgmr.msra.gmra.mxu0 %vm78_vm0, %v68_v4  ;;  %s702_s24 = sshll.u32 %s929_s23, 4  ;;  %s703_s24 = int_to_ptr.vmem [resolvable:$true] %s702_s24 }
  0x1e   :  { %719 = vmatmul.msk.f32.gmra.mxu0 %vm78_vm0, %v69_v5 }
  0x93   :  { %v102_v7 = vpop.f32.mrf.mxu0 }
  0x94   :  { %v983_v8 = vadd.f32 %v775_v6, %v102_v7 }
  0x96   :  { %239 = vrot.lane.b32.xlu2 %v983_v8, %s916_s9  ;;  %109 = vrot.lane.b32.xlu0 %v983_v8, %s917_s10 }
  0x9b   :  { %v105_v9 = vpop.f32.mrf.mxu0 }
  0x9c   :  { %v987_v10 = vadd.f32 %v775_v6, %v105_v9 }
  0x9e   :  { %267 = vrot.lane.b32.xlu1 %v987_v10, %s916_s9  ;;  %369 = vrot.lane.b32.xlu2 %v983_v8, %s918_s11  ;;  %v770_v35 = vpack.i.bf16 %v987_v10, %v983_v8 }
  0x9f   :  { %137 = vrot.lane.b32.xlu0 %v987_v10, %s917_s10 }
  0xa6   :  { %265 = vrot.lane.b32.xlu1 %v987_v10, %s919_s2  ;;  %499 = vrot.lane.b32.xlu2 %v983_v8, %s920_s12 }
  0xa7   :  { %237 = vrot.lane.b32.xlu0 %v983_v8, %s919_s2 }
  0xae   :  { %367 = vrot.lane.b32.xlu1 %v983_v8, %s921_s13  ;;  %395 = vrot.lane.b32.xlu2 %v987_v10, %s921_s13 }
  0xaf   :  { %497 = vrot.lane.b32.xlu0 %v983_v8, %s922_s14 }
  0xb6   :  { %397 = vrot.lane.b32.xlu1 %v987_v10, %s918_s11 }
  0xb7   :  { %527 = vrot.lane.b32.xlu0 %v987_v10, %s920_s12 }
  0xbe   :  { %525 = vrot.lane.b32.xlu1 %v987_v10, %s922_s14 }
  0xf0   :  { %v240_v11 = vpop.permute.xlu2 %239 }
  0xf8   :  { %v370_v13 = vpop.permute.xlu2 %369 }
 0x100   :  { %v500_v17 = vpop.permute.xlu2 %499 }
 0x108   :  { %v110_v12 = vpop.permute.xlu0 %109  ;;  %v396_v23 = vpop.permute.xlu2 %395 }
 0x109   :  { %720 = vmatpush.xpose.msk.msra.mxu1 %vm111_vm1, %v110_v12 }
 0x10c   :  { %721 = vmatmul.msk.f32.vlgmr.msra.gmra.mxu1 %vm111_vm1, %v983_v8 }
 0x10d   :  { %726 = vmatpush.xpose.msk.msrb.mxu1 %vm111_vm1, %v240_v11 }
 0x110   :  { %v268_v14 = vpop.permute.xlu1 %267 }
 0x111   :  { %v138_v15 = vpop.permute.xlu0 %137  ;;  %728 = vmatpush.xpose.msk.msra.mxu2 %vm111_vm1, %v268_v14 }
 0x112   :  { %722 = vmatpush.xpose.msk.msrb.mxu0 %vm111_vm1, %v138_v15 }
 0x115   :  { %732 = vmatpush.xpose.msk.msrb.mxu2 %vm111_vm1, %v370_v13  ;;  %723 = vmatmul.msk.f32.vlgmr.msrb.gmra.mxu0 %vm111_vm1, %v987_v10 }
 0x118   :  { %v266_v16 = vpop.permute.xlu1 %265 }
 0x119   :  { %v238_v18 = vpop.permute.xlu0 %237  ;;  %729 = vmatmul.msk.f32.vlgmr.msra.gmra.mxu2 %vm111_vm1, %v266_v16 }
 0x11a   :  { %727 = vmatmul.msk.f32.vlgmr.msrb.gmra.mxu1 %vm111_vm1, %v238_v18  ;;  %738 = vmatpush.xpose.msk.msra.mxu2 %vm111_vm1, %v500_v17 }
 0x120   :  { %v368_v19 = vpop.permute.xlu1 %367 }
 0x121   :  { %v498_v20 = vpop.permute.xlu0 %497  ;;  %733 = vmatmul.msk.f32.vlgmr.msrb.gmra.mxu2 %vm111_vm1, %v368_v19 }
 0x128   :  { %v398_v21 = vpop.permute.xlu1 %397 }
 0x129   :  { %v528_v22 = vpop.permute.xlu0 %527  ;;  %734 = vmatpush.xpose.msk.msra.mxu0 %vm111_vm1, %v398_v21  ;;  %739 = vmatmul.msk.f32.vlgmr.msra.gmra.mxu2 %vm111_vm1, %v498_v20 }
 0x12c   :  { %735 = vmatmul.msk.f32.vlgmr.msra.gmra.mxu0 %vm111_vm1, %v396_v23 }
 0x12d   :  { %740 = vmatpush.xpose.msk.msrb.mxu0 %vm111_vm1, %v528_v22 }
 0x130   :  { %v526_v24 = vpop.permute.xlu1 %525 }
 0x134   :  { %741 = vmatmul.msk.f32.vlgmr.msrb.gmra.mxu0 %vm111_vm1, %v526_v24 }
 0x189   :  { %v133_v25 = vpop.f32.mrf.mxu1 }
 0x18a   :  { %v163_v26 = vsel %vm111_vm1, %v133_v25, -inf }
 0x18b   :  { %164 = vmax.xlane.f32.xlu2 %v163_v26 }
 0x192   :  { %v160_v27 = vpop.f32.mrf.mxu0 }
 0x193   :  { %v166_v28 = vsel %vm111_vm1, %v160_v27, -inf }
 0x194   :  { %167 = vmax.xlane.f32.xlu0 %v166_v28 }
 0x197   :  { %v1021_v29 = vpop.f32.mrf.mxu1 }
 0x198   :  { %v293_v30 = vsel %vm111_vm1, %v1021_v29, -inf }
 0x199   :  { %294 = vmax.xlane.f32.xlu1 %v293_v30 }
 0x19c   :  { %v290_v31 = vpop.f32.mrf.mxu2 }
 0x19d   :  { %v296_v32 = vsel %vm111_vm1, %v290_v31, -inf }
 0x19e   :  { %297 = vmax.xlane.f32.xlu2 %v296_v32 }
 0x1a4   :  { %v392_v33 = vpop.f32.mrf.mxu2 }
 0x1a5   :  { %v423_v34 = vsel %vm111_vm1, %v392_v33, -inf }
 0x1a6   :  { %424 = vmax.xlane.f32.xlu2 %v423_v34 }
 0x1a8   :  { %771 = vrot.lane.b32.xlu0 %v770_v35, %s923_s15 }
 0x1a9   :  { %v420_v36 = vpop.f32.mrf.mxu0 }
 0x1aa   :  { %v426_v37 = vsel %vm111_vm1, %v420_v36, -inf }
 0x1ab   :  { %427 = vmax.xlane.f32.xlu1 %v426_v37 }
 0x1ac   :  { %v522_v38 = vpop.f32.mrf.mxu2 }
 0x1ad   :  { %v553_v39 = vsel %vm111_vm1, %v522_v38, -inf }
 0x1b1   :  { %v1031_v40 = vpop.f32.mrf.mxu0 }
 0x1b2   :  { %v556_v41 = vsel %vm111_vm1, %v1031_v40, -inf }
 0x1be   :  { %766 = vrot.lane.b32.xlu2 %v770_v35, %s924_s16 }
 0x1d2   :  { %554 = vmax.xlane.f32.xlu0 %v553_v39 }
 0x1e7   :  { %557 = vmax.xlane.f32.xlu2 %v556_v41 }
 0x1fe   :  { %v165_v42 = vpop.xlane.xlu2 %164 }
 0x1ff   :  { %v169_v43 = vsub.f32 %v133_v25, %v165_v42  ;;  %445 = vrot.lane.b32.xlu2 %v983_v8, %s925_s17 }
 0x201   :  { %v171_v44 = vmul.f32 1.442695, %v169_v43 }
 0x203   :  { %777 = vpow2.f32 %v171_v44 }
 0x207   :  { %v168_v45 = vpop.xlane.xlu0 %167 }
 0x208   :  { %v170_v46 = vsub.f32 %v160_v27, %v168_v45 }
 0x209   :  { %v1037_v47 = vpop.eup %777 }
 0x20a   :  { %v173_v48 = vmul.f32 1.442695, %v170_v46  ;;  %v175_v49 = vsel %vm111_vm1, %v1037_v47, 0.0 }
 0x20b   :  { %176 = vadd.xlane.f32.xlu0 %v175_v49 }
 0x20c   :  { %779 = vpow2.f32 %v173_v48  ;;  %v295_v55 = vpop.xlane.xlu1 %294 }
 0x211   :  { %v298_v50 = vpop.xlane.xlu2 %297 }
 0x212   :  { %v1041_v51 = vpop.eup %779  ;;  %v300_v52 = vsub.f32 %v290_v31, %v298_v50 }
 0x213   :  { %v178_v53 = vsel %vm111_vm1, %v1041_v51, 0.0 }
 0x214   :  { %v303_v54 = vmul.f32 1.442695, %v300_v52  ;;  %179 = vadd.xlane.f32.xlu1 %v178_v53 }
 0x216   :  { %781 = vpow2.f32 %v303_v54 }
 0x219   :  { %v425_v56 = vpop.xlane.xlu2 %424 }
 0x21a   :  { %v772_v57 = vpop.permute.xlu0 %771  ;;  %v429_v63 = vsub.f32 %v392_v33, %v425_v56 }
 0x21b   :  { %v774_v58 = vunpack.i.h.bf16 %v772_v57  ;;  %v773_v27 = vunpack.i.l.bf16 %v772_v57 }
 0x21c   :  { %v1045_v59 = vpop.eup %781  ;;  %v431_v4 = vmul.f32 1.442695, %v429_v63  ;;  %v659_v63 = vld [vmem:[#allocation7] sm:$0xff] }
 0x21d   :  { %362 = vmatpush.msra.mxu1 %v774_v58  ;;  %v308_v60 = vsel %vm111_vm1, %v1045_v59, 0.0 }
 0x21e   :  { %v428_v61 = vpop.xlane.xlu1 %427  ;;  %309 = vadd.xlane.f32.xlu1 %v308_v60  ;;  %v662_v60 = vld [vmem:[#allocation7 + $0x18] sm:$0xff] }
 0x21f   :  { %v430_v62 = vsub.f32 %v420_v36, %v428_v61  ;;  %575 = vrot.lane.b32.xlu0 %v983_v8, %s926_s18  ;;  %v299_v8 = vsub.f32 %v1021_v29, %v295_v55  ;;  %v661_v61 = vld [vmem:[#allocation7 + $0x10] sm:$0xff]  ;;  %685 = vmatpush.msrb.mxu2 %v662_v60 }
 0x221   :  { %v433_v0 = vmul.f32 1.442695, %v430_v62  ;;  %v767_v1 = vpop.permute.xlu2 %766  ;;  %v301_v11 = vmul.f32 1.442695, %v299_v8  ;;  %v660_v62 = vld [vmem:[#allocation7 + $0x8] sm:$0xff]  ;;  %686 = vmatpush.msrb.mxu2 %v661_v61 }
 0x222   :  { %v768_v2 = vunpack.i.l.bf16 %v767_v1  ;;  %v769_v3 = vunpack.i.h.bf16 %v767_v1 }
 0x223   :  { %783 = vpow2.f32 %v433_v0  ;;  %687 = vmatpush.msrb.mxu2 %v660_v62 }
 0x224   :  { %206 = vmatpush.msra.mxu3 %v768_v2  ;;  %785 = vpow2.f32 %v431_v4 }
 0x225   :  { %787 = vpow2.f32 %v301_v11  ;;  %688 = vmatpush.msrb.mxu2 %v659_v63 }
 0x226   :  { %232 = vmatpush.msrb.mxu3 %v769_v3 }
 0x229   :  { %v1051_v5 = vpop.eup %783 }
 0x22a   :  { %v438_v6 = vsel %vm111_vm1, %v1051_v5, 0.0  ;;  %v786_v7 = vpop.eup %785 }
 0x22b   :  { %439 = vadd.xlane.f32.xlu1 %v438_v6  ;;  %v435_v9 = vsel %vm111_vm1, %v786_v7, 0.0  ;;  %v788_v12 = vpop.eup %787 }
 0x22c   :  { %v305_v16 = vsel %vm111_vm1, %v788_v12, 0.0 }
 0x233   :  { %436 = vadd.xlane.f32.xlu1 %v435_v9 }
 0x245   :  { %v555_v13 = vpop.xlane.xlu0 %554 }
 0x246   :  { %v559_v14 = vsub.f32 %v522_v38, %v555_v13  ;;  %v776_v13 = vld [vmem:[%s1098_s4] ss:$0 sm:$0xff] }
 0x248   :  { %v561_v15 = vmul.f32 1.442695, %v559_v14 }
 0x249   :  { %306 = vadd.xlane.f32.xlu0 %v305_v16 }
 0x24a   :  { %789 = vpow2.f32 %v561_v15 }
 0x250   :  { %v790_v17 = vpop.eup %789 }
 0x251   :  { %v565_v18 = vsel %vm111_vm1, %v790_v17, 0.0 }
 0x252   :  { %566 = vadd.xlane.f32.xlu1 %v565_v18 }
 0x25a   :  { %v558_v19 = vpop.xlane.xlu2 %557 }
 0x25b   :  { %v560_v20 = vsub.f32 %v1031_v40, %v558_v19 }
 0x25d   :  { %v563_v21 = vmul.f32 1.442695, %v560_v20  ;;  %601 = vrot.lane.b32.xlu0 %v987_v10, %s926_s18 }
 0x25f   :  { %791 = vpow2.f32 %v563_v21 }
 0x262   :  { %v446_v31 = vpop.permute.xlu2 %445 }
 0x265   :  { %v792_v22 = vpop.eup %791 }
 0x266   :  { %v568_v23 = vsel %vm111_vm1, %v792_v22, 0.0 }
 0x267   :  { %569 = vadd.xlane.f32.xlu2 %v568_v23 }
 0x26b   :  { %471 = vrot.lane.b32.xlu1 %v987_v10, %s925_s17 }
 0x27e   :  { %v177_v24 = vpop.xlane.xlu0 %176 }
 0x27f   :  { %793 = vrcp.f32 %v177_v24 }
 0x285   :  { %v794_v25 = vpop.eup %793 }
 0x286   :  { %v183_v26 = vmul.f32 %v794_v25, %v1037_v47 }
 0x287   :  { %v180_v28 = vpop.xlane.xlu1 %179 }
 0x288   :  { %795 = vrcp.f32 %v180_v28  ;;  %724 = vmatmul.msk.f32.vlgmr.msra.gmra.mxu3 %vm111_vm1, %v183_v26 }
 0x289   :  { %336 = vmatpush.msra.mxu3 %v773_v27 }
 0x28e   :  { %v796_v29 = vpop.eup %795 }
 0x28f   :  { %v184_v30 = vmul.f32 %v796_v29, %v1041_v51 }
 0x291   :  { %725 = vmatmul.msk.f32.vlgmr.msrb.gmra.mxu3 %vm111_vm1, %v184_v30  ;;  %v310_v32 = vpop.xlane.xlu1 %309  ;;  %v576_v34 = vpop.permute.xlu0 %575 }
 0x292   :  { %466 = vmatpush.msrb.mxu3 %v446_v31  ;;  %797 = vrcp.f32 %v310_v32 }
 0x298   :  { %v798_v10 = vpop.eup %797 }
 0x299   :  { %v314_v33 = vmul.f32 %v798_v10, %v1045_v59 }
 0x29b   :  { %731 = vmatmul.msk.f32.vlgmr.msra.gmra.mxu1 %vm111_vm1, %v314_v33 }
 0x29e   :  { %v440_v35 = vpop.xlane.xlu1 %439 }
 0x2a6   :  { %v437_v37 = vpop.xlane.xlu1 %436 }
 0x2bc   :  { %v307_v36 = vpop.xlane.xlu0 %306 }
 0x2bd   :  { %799 = vrcp.f32 %v307_v36 }
 0x2be   :  { %801 = vrcp.f32 %v437_v37 }
 0x2c3   :  { %v800_v38 = vpop.eup %799 }
 0x2c4   :  { %v313_v39 = vmul.f32 %v800_v38, %v788_v12  ;;  %v802_v41 = vpop.eup %801 }
 0x2c5   :  { %v567_v40 = vpop.xlane.xlu1 %566  ;;  %v443_v42 = vmul.f32 %v802_v41, %v786_v7 }
 0x2c6   :  { %730 = vmatmul.msk.f32.vlgmr.msra.gmra.mxu3 %vm111_vm1, %v313_v39  ;;  %803 = vrcp.f32 %v567_v40 }
 0x2c7   :  { %596 = vmatpush.msra.mxu3 %v576_v34  ;;  %805 = vrcp.f32 %v440_v35 }
 0x2cc   :  { %v804_v43 = vpop.eup %803 }
 0x2cd   :  { %v573_v44 = vmul.f32 %v804_v43, %v790_v17  ;;  %v806_v45 = vpop.eup %805 }
 0x2ce   :  { %736 = vmatmul.msk.f32.vlgmr.msrb.gmra.mxu3 %vm111_vm1, %v443_v42  ;;  %v444_v47 = vmul.f32 %v806_v45, %v1051_v5 }
 0x2cf   :  { %v602_v49 = vpop.permute.xlu0 %601 }
 0x2d6   :  { %742 = vmatmul.msk.f32.vlgmr.msra.gmra.mxu3 %vm111_vm1, %v573_v44 }
 0x2da   :  { %v570_v46 = vpop.xlane.xlu2 %569 }
 0x2db   :  { %807 = vrcp.f32 %v570_v46 }
 0x2dd   :  { %v472_v48 = vpop.permute.xlu1 %471 }
 0x2de   :  { %492 = vmatpush.msrb.mxu1 %v472_v48 }
 0x2df   :  { %737 = vmatmul.msk.f32.vlgmr.msrb.gmra.mxu1 %vm111_vm1, %v444_v47 }
 0x2e0   :  { %622 = vmatpush.msra.mxu1 %v602_v49 }
 0x2e1   :  { %v808_v50 = vpop.eup %807 }
 0x2e2   :  { %v574_v51 = vmul.f32 %v808_v50, %v792_v22 }
 0x2e7   :  { %743 = vmatmul.msk.f32.vlgmr.msra.gmra.mxu1 %vm111_vm1, %v574_v51 }
 0x30b   :  { %v208_v52 = vpop.f32.mrf.mxu3 }
 0x314   :  { %v234_v53 = vpop.f32.mrf.mxu3 }
 0x318   :  { %v364_v56 = vpop.f32.mrf.mxu1 }
 0x349   :  { %v338_v54 = vpop.f32.mrf.mxu3 }
 0x34a   :  { %629 = vrot.lane.b32.xlu0 %v338_v54, %s913_s27 }
 0x351   :  { %v468_v55 = vpop.f32.mrf.mxu3 }
 0x352   :  { %637 = vrot.lane.b32.xlu0 %v468_v55, %s927_s19 }
 0x359   :  { %v598_v57 = vpop.f32.mrf.mxu3 }
 0x35a   :  { %631 = vrot.lane.b32.xlu0 %v364_v56, %s913_s27  ;;  %645 = vrot.lane.b32.xlu1 %v598_v57, %s928_s20 }
 0x35c   :  { %v494_v58 = vpop.f32.mrf.mxu1 }
 0x362   :  { %639 = vrot.lane.b32.xlu1 %v494_v58, %s927_s19 }
 0x364   :  { %v624_v59 = vpop.f32.mrf.mxu1 }
 0x365   :  { %647 = vrot.lane.b32.xlu0 %v624_v59, %s928_s20 }
 0x3bc   :  { %v630_v0 = vpop.permute.xlu0 %629 }
 0x3bd   :  { %v651_v2 = vsel %vm111_vm1, %v208_v52, %v630_v0 }
 0x3c4   :  { %v638_v1 = vpop.permute.xlu0 %637 }
 0x3c5   :  { %v654_v3 = vsel %vm653_vm2, %v651_v2, %v638_v1 }
 0x3cc   :  { %v646_v4 = vpop.permute.xlu1 %645  ;;  %v632_v6 = vpop.permute.xlu0 %631 }
 0x3cd   :  { %v657_v5 = vsel %vm656_vm3, %v654_v3, %v646_v4  ;;  %v652_v7 = vsel %vm111_vm1, %v234_v53, %v632_v6 }
 0x3ce   :  { %744 = vmatmul.msk.f32.vlgmr.msrb.gmra.mxu2 %vm78_vm0, %v657_v5 }
 0x3d4   :  { %v640_v9 = vpop.permute.xlu1 %639 }
 0x3d5   :  { %v655_v8 = vsel %vm653_vm2, %v652_v7, %v640_v9 }
 0x3d7   :  { %v648_v11 = vpop.permute.xlu0 %647 }
 0x3d8   :  { %v658_v12 = vsel %vm656_vm3, %v655_v8, %v648_v11 }
 0x3d9   :  { %745 = vmatmul.msk.f32.gmra.mxu2 %vm78_vm0, %v658_v12 }
 0x451   :  { %v690_v14 = vpop.f32.mrf.mxu2 }
 0x452   :  { %v691_v15 = vadd.f32 %v776_v13, %v690_v14 }
 0x454   :  { %696 = vst.msk [vmem:[#allocation8] sm:$0xff] %vm78_vm0, %v691_v15 }
 0x45c   :  { %v693_v16 = vpop.f32.mrf.mxu2 }
 0x45d   :  { %v694_v17 = vadd.f32 %v776_v13, %v693_v16 }
 0x45f   :  { %697 = vst.msk [vmem:[#allocation8 + $0x8] sm:$0xff] %vm78_vm0, %v694_v17 }
 0x460   :  { %710 = dma.vmem_to_hbm [thread:$0]  %s703_s24, 256, %s705_s29, [#allocation4], %s912_s26, %s912_s26, %s913_s27  }
 0x461   :  { %909 = dma.done.wait [#allocation4], 256  }
 0x462   :  { %910 = vsyncadd [#allocation4], 4294967040 }
 0x463   :  { %715 = vsyncpa [#allocation3], 1 }
 0x464   :  { %716 = vsyncpa [#allocation6], 1 }
 0x465   :  { %717 = vsyncpa [#allocation4], 1 }

</bundles_post_ra>
